<compile_context>
chip_gen: v5e
topology: v5e:2x2
jax: 0.10.0
libtpu: 0.0.40
codegen_flags: <defaults>
</compile_context>

<pallas_src>
import jax
import jax.numpy as jnp
from jax.experimental import pallas as pl
from jax.experimental.pallas import tpu as pltpu

# ---- problem sizes (small, consistent with the module's forward) ------------
B = 2              # batch
C_IN = 4           # input image channels
H_IMG = W_IMG = 16
C_FEAT = 32        # cnn.output_channels[-1] == LSTM input_size
HIDDEN = 32        # lstm_params['hidden_size']  (== C_FEAT so layer weights stack)
NUM_LAYERS = 2     # lstm_params['num_layers']
BIDIRECTIONAL = False  # lstm_params.get('bidirectional', False)
N_CLASSES = 10
KH = KW = 3        # conv kernel

K_IM2COL = KH * KW * C_IN        # 36
K_PAD = 128                      # lane-dense contraction dim for the conv matmul
FC_PAD = 128                     # lane-dense fc output width
ROWS = B * H_IMG * W_IMG         # 512 im2col rows

assert C_FEAT == HIDDEN, "layer-stacked LSTM weights require input_size == hidden_size"


# ---------------------------- fused Pallas kernel -----------------------------
def cnn_lstm_fused_kernel(cols_ref, w_conv_ref, b_conv_ref, pool_ref,
                          w_ih_t_ref, b_lstm_ref, w_fc_t_ref, b_fc_ref,
                          out_ref):
    """conv(im2col) + ReLU + avg-pool + stacked LSTM (seq_len=1) + fc.

    cols_ref   : (ROWS, K_PAD)          lane-dense im2col patches (zero-padded K)
    w_conv_ref : (K_PAD, C_FEAT)        flattened conv weight, zero-padded K
    b_conv_ref : (1, C_FEAT)
    pool_ref   : (B, ROWS)              per-batch averaging matrix (1/(H*W))
    w_ih_t_ref : (L, C_FEAT, 4*HIDDEN)  torch weight_ih_l{k}, pre-transposed
    b_lstm_ref : (L, 1, 4*HIDDEN)       b_ih_l{k} + b_hh_l{k}
    w_fc_t_ref : (HIDDEN, FC_PAD)       torch fc.weight^T, lane-padded
    b_fc_ref   : (1, FC_PAD)
    out_ref    : (B, FC_PAD)
    """
    # ---- conv as ONE MXU matmul (zero-padded K contributes nothing) ----------
    acc = jnp.dot(cols_ref[...], w_conv_ref[...],
                  preferred_element_type=jnp.float32)        # (ROWS, C_FEAT)
    acc = jnp.maximum(acc + b_conv_ref[...], 0.0)            # bias + ReLU

    # ---- global average pool on the MXU: (B,ROWS)@(ROWS,C_FEAT) -------------
    h = jnp.dot(pool_ref[...], acc, preferred_element_type=jnp.float32)  # (B, C_FEAT)

    # ---- stacked unidirectional LSTM, length-1 sequence, zero (h0, c0) ------
    # With zero initial state, W_hh @ h0 and f * c0 are exactly zero -> omitted.
    # PyTorch gate order in weight_ih_l{k}: [i | f | g | o].
    for l in range(NUM_LAYERS):                         # static unroll (L = 2)
        gates = jnp.dot(h, w_ih_t_ref[l],
                        preferred_element_type=jnp.float32) + b_lstm_ref[l]  # (B, 4H)
        sg = jax.nn.sigmoid(gates)                  # one full 128-lane EUP pass
        i = sg[:, 0 * HIDDEN:1 * HIDDEN]            # input gate
        o = sg[:, 3 * HIDDEN:4 * HIDDEN]            # output gate
        g = jnp.tanh(gates[:, 2 * HIDDEN:3 * HIDDEN])
        h = o * jnp.tanh(i * g)                     # c = f*c0 + i*g == i*g
        # TODO(synk): nn.LSTM inter-layer dropout applies only in training mode;
        # this kernel implements inference semantics (no dropout).

    # ---- final Linear, lane-padded output (unmasked 128-lane stores) --------
    out_ref[...] = jnp.dot(h, w_fc_t_ref[...],
                           preferred_element_type=jnp.float32) + b_fc_ref[...]


# ------------------------------- wrapper --------------------------------------
@jax.jit
def cnn_lstm_forward(x_nchw, params):
    # NOTE: the torch forward does x.unsqueeze(1) -> seq_len == 1 with zero
    # (h0, c0).  This wrapper/kernel bakes that in; it is NOT a general LSTM.
    x = jnp.transpose(x_nchw, (0, 2, 3, 1)).astype(jnp.float32)   # NHWC
    xp = jnp.pad(x, ((0, 0), (1, 1), (1, 1), (0, 0)))             # 'same' padding

    # im2col: (B, H, W, KH*KW*C_IN) -> (ROWS, K_IM2COL), then pad K to 128 lanes
    # (wrapper-side layout plumbing so the kernel sees a lane-dense matmul).
    patches = [xp[:, kh:kh + H_IMG, kw:kw + W_IMG, :]
               for kh in range(KH) for kw in range(KW)]
    cols = jnp.concatenate(patches, axis=-1).reshape(ROWS, K_IM2COL)
    cols = jnp.pad(cols, ((0, 0), (0, K_PAD - K_IM2COL)))         # (512, 128)

    vmem = pl.BlockSpec(memory_space=pltpu.MemorySpace.VMEM)
    out_p = pl.pallas_call(
        cnn_lstm_fused_kernel,
        out_shape=jax.ShapeDtypeStruct((B, FC_PAD), jnp.float32),
        in_specs=[vmem] * 8,
        out_specs=vmem,
    )(cols, params['w_conv_cols_p'], params['conv_b'], params['pool'],
      params['w_ih_t'], params['b_lstm'], params['w_fc_t_p'], params['b_fc_p'])
    return out_p[:, :N_CLASSES]


# --------------------------- deterministic params -----------------------------
def init_params(key):
    ks = jax.random.split(key, 7)
    conv_w = 0.1 * jax.random.normal(ks[0], (C_FEAT, C_IN, KH, KW), jnp.float32)   # torch OIHW
    conv_b = 0.1 * jax.random.normal(ks[1], (C_FEAT,), jnp.float32)
    w_ih   = 0.1 * jax.random.normal(ks[2], (NUM_LAYERS, 4 * HIDDEN, C_FEAT), jnp.float32)
    b_ih   = 0.1 * jax.random.normal(ks[3], (NUM_LAYERS, 4 * HIDDEN), jnp.float32)
    b_hh   = 0.1 * jax.random.normal(ks[4], (NUM_LAYERS, 4 * HIDDEN), jnp.float32)
    w_fc   = 0.1 * jax.random.normal(ks[5], (N_CLASSES, HIDDEN), jnp.float32)
    b_fc   = 0.1 * jax.random.normal(ks[6], (N_CLASSES,), jnp.float32)

    conv_w_hwio = jnp.transpose(conv_w, (2, 3, 1, 0))              # (KH,KW,Cin,Cout)
    w_conv_cols = conv_w_hwio.reshape(K_IM2COL, C_FEAT)            # (36, 32)
    w_conv_cols_p = jnp.pad(w_conv_cols, ((0, K_PAD - K_IM2COL), (0, 0)))  # (128, 32)
    w_fc_t = jnp.transpose(w_fc)                                   # (32, 10)
    w_fc_t_p = jnp.pad(w_fc_t, ((0, 0), (0, FC_PAD - N_CLASSES)))  # (32, 128)
    b_fc_p = jnp.pad(b_fc, (0, FC_PAD - N_CLASSES)).reshape(1, FC_PAD)

    # Per-batch averaging matrix (constant): pool @ relu(conv) == mean over H*W.
    pool = (jnp.arange(ROWS)[None, :] // (H_IMG * W_IMG)
            == jnp.arange(B)[:, None]).astype(jnp.float32) / (H_IMG * W_IMG)  # (B, ROWS)

    return {
        # kernel-facing (packed / lane-padded) params
        'w_conv_cols_p': w_conv_cols_p,
        'conv_b':        conv_b.reshape(1, C_FEAT),
        'pool':          pool,
        'w_ih_t':        jnp.transpose(w_ih, (0, 2, 1)),           # (L, C_FEAT, 4H)
        'b_lstm':        (b_ih + b_hh).reshape(NUM_LAYERS, 1, 4 * HIDDEN),
        'w_fc_t_p':      w_fc_t_p,
        'b_fc_p':        b_fc_p,
        # reference-facing (unpadded) params
        'conv_w_hwio':   conv_w_hwio,
        'w_fc_t':        w_fc_t,
        'b_fc':          b_fc.reshape(1, N_CLASSES),
    }


# ------------------------- plain-JAX reference (check) ------------------------
def reference_forward(x_nchw, params):
    x = jnp.transpose(x_nchw, (0, 2, 3, 1)).astype(jnp.float32)
    xp = jnp.pad(x, ((0, 0), (1, 1), (1, 1), (0, 0)))
    acc = jnp.zeros((B, H_IMG, W_IMG, C_FEAT), jnp.float32)
    for kh in range(KH):
        for kw in range(KW):
            patch = xp[:, kh:kh + H_IMG, kw:kw + W_IMG, :]
            acc = acc + jnp.einsum('bhwc,cd->bhwd', patch, params['conv_w_hwio'][kh, kw])
    acc = jnp.maximum(acc + params['conv_b'].reshape(1, 1, 1, C_FEAT), 0.0)
    h = jnp.mean(acc, axis=(1, 2))
    for l in range(NUM_LAYERS):
        gates = h @ params['w_ih_t'][l] + params['b_lstm'][l]
        i = jax.nn.sigmoid(gates[:, 0 * HIDDEN:1 * HIDDEN])
        g = jnp.tanh(gates[:, 2 * HIDDEN:3 * HIDDEN])
        o = jax.nn.sigmoid(gates[:, 3 * HIDDEN:4 * HIDDEN])
        h = o * jnp.tanh(i * g)
    return h @ params['w_fc_t'] + params['b_fc']


if __name__ == "__main__":
    key = jax.random.PRNGKey(0)
    k_x, k_p = jax.random.split(key)
    x = jax.random.normal(k_x, (B, C_IN, H_IMG, W_IMG), jnp.float32)
    params = init_params(k_p)

    out = jax.block_until_ready(cnn_lstm_forward(x, params))
    ref = jax.block_until_ready(reference_forward(x, params))

    assert out.shape == (B, N_CLASSES)
    assert jnp.all(jnp.isfinite(out))
    assert jnp.allclose(out, ref, rtol=1e-2, atol=1e-2)
    print("KERNEL_OK")
</pallas_src>

<mosaic_0001>
module attributes {stable_mosaic.version = 11 : i64} {
  func.func @cnn_lstm_fused_kernel(%arg0: memref<512x128xf32, #tpu.memory_space<vmem>>, %arg1: memref<128x32xf32, #tpu.memory_space<vmem>>, %arg2: memref<1x32xf32, #tpu.memory_space<vmem>>, %arg3: memref<2x512xf32, #tpu.memory_space<vmem>>, %arg4: memref<2x32x128xf32, #tpu.memory_space<vmem>>, %arg5: memref<2x1x128xf32, #tpu.memory_space<vmem>>, %arg6: memref<32x128xf32, #tpu.memory_space<vmem>>, %arg7: memref<1x128xf32, #tpu.memory_space<vmem>>, %arg8: memref<2x128xf32, #tpu.memory_space<vmem>>) attributes {dimension_semantics = [], scalar_prefetch = 0 : i64, scratch_operands = 0 : i64, tpu.core_type = #tpu.core_type<tc>} {
    %c0 = arith.constant 0 : index
    %c0_0 = arith.constant 0 : index
    %0 = vector.load %arg0[%c0, %c0_0] : memref<512x128xf32, #tpu.memory_space<vmem>>, vector<512x128xf32>
    %c0_1 = arith.constant 0 : index
    %c0_2 = arith.constant 0 : index
    %1 = vector.load %arg1[%c0_1, %c0_2] : memref<128x32xf32, #tpu.memory_space<vmem>>, vector<128x32xf32>
    %cst = arith.constant dense<0.000000e+00> : vector<512x32xf32>
    %2 = tpu.matmul %0, %1, %cst {dimension_numbers = #tpu.dot_dimension_numbers<[1], [0], [0], [1], [0, 0, 1, 1], [], []>} : vector<512x128xf32>, vector<128x32xf32>, vector<512x32xf32> -> vector<512x32xf32>
    %c0_3 = arith.constant 0 : index
    %c0_4 = arith.constant 0 : index
    %3 = vector.load %arg2[%c0_3, %c0_4] : memref<1x32xf32, #tpu.memory_space<vmem>>, vector<1x32xf32>
    %4 = vector.broadcast %3 : vector<1x32xf32> to vector<512x32xf32>
    %5 = arith.addf %2, %4 : vector<512x32xf32>
    %cst_5 = arith.constant 0.000000e+00 : f32
    %6 = vector.broadcast %cst_5 : f32 to vector<512x32xf32>
    %7 = arith.maximumf %5, %6 : vector<512x32xf32>
    %c0_6 = arith.constant 0 : index
    %c0_7 = arith.constant 0 : index
    %8 = vector.load %arg3[%c0_6, %c0_7] : memref<2x512xf32, #tpu.memory_space<vmem>>, vector<2x512xf32>
    %cst_8 = arith.constant dense<0.000000e+00> : vector<2x32xf32>
    %9 = tpu.matmul %8, %7, %cst_8 {dimension_numbers = #tpu.dot_dimension_numbers<[1], [0], [0], [1], [0, 0, 1, 1], [], []>} : vector<2x512xf32>, vector<512x32xf32>, vector<2x32xf32> -> vector<2x32xf32>
    %c0_9 = arith.constant 0 : index
    %c0_10 = arith.constant 0 : index
    %c0_11 = arith.constant 0 : index
    %10 = vector.load %arg4[%c0_9, %c0_10, %c0_11] : memref<2x32x128xf32, #tpu.memory_space<vmem>>, vector<1x32x128xf32>
    %11 = vector.shape_cast %10 : vector<1x32x128xf32> to vector<32x128xf32>
    %cst_12 = arith.constant dense<0.000000e+00> : vector<2x128xf32>
    %12 = tpu.matmul %9, %11, %cst_12 {dimension_numbers = #tpu.dot_dimension_numbers<[1], [0], [0], [1], [0, 0, 1, 1], [], []>} : vector<2x32xf32>, vector<32x128xf32>, vector<2x128xf32> -> vector<2x128xf32>
    %c0_13 = arith.constant 0 : index
    %c0_14 = arith.constant 0 : index
    %c0_15 = arith.constant 0 : index
    %13 = vector.load %arg5[%c0_13, %c0_14, %c0_15] : memref<2x1x128xf32, #tpu.memory_space<vmem>>, vector<1x1x128xf32>
    %14 = vector.shape_cast %13 : vector<1x1x128xf32> to vector<1x128xf32>
    %15 = vector.broadcast %14 : vector<1x128xf32> to vector<2x128xf32>
    %16 = arith.addf %12, %15 : vector<2x128xf32>
    %17 = arith.negf %16 : vector<2x128xf32>
    %18 = math.exp %17 : vector<2x128xf32>
    %cst_16 = arith.constant 1.000000e+00 : f32
    %19 = vector.broadcast %cst_16 : f32 to vector<2x128xf32>
    %20 = arith.addf %19, %18 : vector<2x128xf32>
    %21 = arith.divf %19, %20 : vector<2x128xf32>
    %22 = vector.extract_strided_slice %21 {offsets = [0, 0], sizes = [2, 32], strides = [1, 1]} : vector<2x128xf32> to vector<2x32xf32>
    %23 = vector.extract_strided_slice %21 {offsets = [0, 96], sizes = [2, 32], strides = [1, 1]} : vector<2x128xf32> to vector<2x32xf32>
    %24 = vector.extract_strided_slice %16 {offsets = [0, 64], sizes = [2, 32], strides = [1, 1]} : vector<2x128xf32> to vector<2x32xf32>
    %25 = math.tanh %24 : vector<2x32xf32>
    %26 = arith.mulf %22, %25 : vector<2x32xf32>
    %27 = math.tanh %26 : vector<2x32xf32>
    %28 = arith.mulf %23, %27 : vector<2x32xf32>
    %c1 = arith.constant 1 : index
    %c0_17 = arith.constant 0 : index
    %c0_18 = arith.constant 0 : index
    %29 = vector.load %arg4[%c1, %c0_17, %c0_18] : memref<2x32x128xf32, #tpu.memory_space<vmem>>, vector<1x32x128xf32>
    %30 = vector.shape_cast %29 : vector<1x32x128xf32> to vector<32x128xf32>
    %cst_19 = arith.constant dense<0.000000e+00> : vector<2x128xf32>
    %31 = tpu.matmul %28, %30, %cst_19 {dimension_numbers = #tpu.dot_dimension_numbers<[1], [0], [0], [1], [0, 0, 1, 1], [], []>} : vector<2x32xf32>, vector<32x128xf32>, vector<2x128xf32> -> vector<2x128xf32>
    %c1_20 = arith.constant 1 : index
    %c0_21 = arith.constant 0 : index
    %c0_22 = arith.constant 0 : index
    %32 = vector.load %arg5[%c1_20, %c0_21, %c0_22] : memref<2x1x128xf32, #tpu.memory_space<vmem>>, vector<1x1x128xf32>
    %33 = vector.shape_cast %32 : vector<1x1x128xf32> to vector<1x128xf32>
    %34 = vector.broadcast %33 : vector<1x128xf32> to vector<2x128xf32>
    %35 = arith.addf %31, %34 : vector<2x128xf32>
    %36 = arith.negf %35 : vector<2x128xf32>
    %37 = math.exp %36 : vector<2x128xf32>
    %cst_23 = arith.constant 1.000000e+00 : f32
    %38 = vector.broadcast %cst_23 : f32 to vector<2x128xf32>
    %39 = arith.addf %38, %37 : vector<2x128xf32>
    %40 = arith.divf %38, %39 : vector<2x128xf32>
    %41 = vector.extract_strided_slice %40 {offsets = [0, 0], sizes = [2, 32], strides = [1, 1]} : vector<2x128xf32> to vector<2x32xf32>
    %42 = vector.extract_strided_slice %40 {offsets = [0, 96], sizes = [2, 32], strides = [1, 1]} : vector<2x128xf32> to vector<2x32xf32>
    %43 = vector.extract_strided_slice %35 {offsets = [0, 64], sizes = [2, 32], strides = [1, 1]} : vector<2x128xf32> to vector<2x32xf32>
    %44 = math.tanh %43 : vector<2x32xf32>
    %45 = arith.mulf %41, %44 : vector<2x32xf32>
    %46 = math.tanh %45 : vector<2x32xf32>
    %47 = arith.mulf %42, %46 : vector<2x32xf32>
    %c0_24 = arith.constant 0 : index
    %c0_25 = arith.constant 0 : index
    %48 = vector.load %arg6[%c0_24, %c0_25] : memref<32x128xf32, #tpu.memory_space<vmem>>, vector<32x128xf32>
    %cst_26 = arith.constant dense<0.000000e+00> : vector<2x128xf32>
    %49 = tpu.matmul %47, %48, %cst_26 {dimension_numbers = #tpu.dot_dimension_numbers<[1], [0], [0], [1], [0, 0, 1, 1], [], []>} : vector<2x32xf32>, vector<32x128xf32>, vector<2x128xf32> -> vector<2x128xf32>
    %c0_27 = arith.constant 0 : index
    %c0_28 = arith.constant 0 : index
    %50 = vector.load %arg7[%c0_27, %c0_28] : memref<1x128xf32, #tpu.memory_space<vmem>>, vector<1x128xf32>
    %51 = vector.broadcast %50 : vector<1x128xf32> to vector<2x128xf32>
    %52 = arith.addf %49, %51 : vector<2x128xf32>
    %c0_29 = arith.constant 0 : index
    %c0_30 = arith.constant 0 : index
    %53 = vector.load %arg8[%c0_29, %c0_30] : memref<2x128xf32, #tpu.memory_space<vmem>>, vector<2x128xf32>
    tpu.vector_store %arg8[%c0_29, %c0_30], %52 {strides = array<i32>} : memref<2x128xf32, #tpu.memory_space<vmem>>, vector<2x128xf32>,
    return
  }
}

</mosaic_0001>

<bundles_post_ra>
// kernel: cnn_lstm_forward.1
= control target key start
LH: loop header
LB: loop body
LE: loop exit
PB: predicated region body
PF: predicated region fallthrough
CT: control target
= control target key end

     0   :  { %s1303_s0 = inlined_call_operand.vmem [shape: f32[512,128], index: 0, kind: input, shape index: {}]   ;;  %s1304_s1 = inlined_call_operand.vmem [shape: f32[128,32], index: 1, kind: input, shape index: {}]   ;;  %s1305_s2 = inlined_call_operand.vmem [shape: f32[1,32], index: 2, kind: input, shape index: {}]   ;;  %s1306_s3 = inlined_call_operand.vmem [shape: f32[2,512], index: 3, kind: input, shape index: {}]   ;;  %s1307_s4 = inlined_call_operand.vmem [shape: f32[2,32,128], index: 4, kind: input, shape index: {}]   ;;  %s1308_s5 = inlined_call_operand.vmem [shape: f32[2,1,128], index: 5, kind: input, shape index: {}]   ;;  %s1309_s6 = inlined_call_operand.vmem [shape: f32[32,128], index: 6, kind: input, shape index: {}]   ;;  %s1310_s7 = inlined_call_operand.vmem [shape: f32[1,128], index: 7, kind: input, shape index: {}]   ;;  %s1311_s8 = inlined_call_operand.hbm [shape: f32[2,128], index: 8, kind: output, shape index: {}]  }
   0x1   :  { %v109_v0 = vld [vmem:[%s1304_s1 + $0x78] sm:$0xff]  ;;  %v108_v1 = vld [vmem:[%s1304_s1 + $0x70] sm:$0xff]  ;;  %v107_v2 = vld [vmem:[%s1304_s1 + $0x68] sm:$0xff] }
   0x2   :  { %114 = vmatpush.msra.mxu0 %v109_v0  ;;  %667 = vmatpush.msra.mxu1 %v109_v0  ;;  %v106_v3 = vld [vmem:[%s1304_s1 + $0x60] sm:$0xff]  ;;  %v105_v4 = vld [vmem:[%s1304_s1 + $0x58] sm:$0xff]  ;;  %v104_v5 = vld [vmem:[%s1304_s1 + $0x50] sm:$0xff] }
   0x3   :  { %668 = vmatpush.msra.mxu2 %v109_v0  ;;  %669 = vmatpush.msra.mxu3 %v109_v0 }
   0x4   :  { %115 = vmatpush.msra.mxu0 %v108_v1  ;;  %670 = vmatpush.msra.mxu1 %v108_v1 }
   0x5   :  { %671 = vmatpush.msra.mxu2 %v108_v1  ;;  %672 = vmatpush.msra.mxu3 %v108_v1 }
   0x6   :  { %116 = vmatpush.msra.mxu0 %v107_v2  ;;  %673 = vmatpush.msra.mxu1 %v107_v2 }
   0x7   :  { %674 = vmatpush.msra.mxu2 %v107_v2  ;;  %675 = vmatpush.msra.mxu3 %v107_v2 }
   0x8   :  { %117 = vmatpush.msra.mxu0 %v106_v3  ;;  %676 = vmatpush.msra.mxu1 %v106_v3 }
   0x9   :  { %677 = vmatpush.msra.mxu2 %v106_v3  ;;  %678 = vmatpush.msra.mxu3 %v106_v3 }
   0xa   :  { %13 = vsyncpa [#allocation3], 0  ;;  %118 = vmatpush.msra.mxu0 %v105_v4  ;;  %679 = vmatpush.msra.mxu1 %v105_v4  ;;  %v103_v6 = vld [vmem:[%s1304_s1 + $0x48] sm:$0xff]  ;;  %v102_v7 = vld [vmem:[%s1304_s1 + $0x40] sm:$0xff]  ;;  %vm486_vm0 = vcmask 261120   ;;  %s765_s16 = smov 64  }
   0xb   :  { %680 = vmatpush.msra.mxu2 %v105_v4  ;;  %681 = vmatpush.msra.mxu3 %v105_v4  ;;  %v101_v8 = vld [vmem:[%s1304_s1 + $0x38] sm:$0xff]  ;;  %v100_v9 = vld [vmem:[%s1304_s1 + $0x30] sm:$0xff]  ;;  %v99_v10 = vld [vmem:[%s1304_s1 + $0x28] sm:$0xff]  ;;  %s766_s17 = smov 96   ;;  %s767_s25 = smov 32  }
   0xc   :  { %119 = vmatpush.msra.mxu0 %v104_v5  ;;  %682 = vmatpush.msra.mxu1 %v104_v5  ;;  %v98_v11 = vld [vmem:[%s1304_s1 + $0x20] sm:$0xff]  ;;  %v97_v12 = vld [vmem:[%s1304_s1 + $0x18] sm:$0xff]  ;;  %v96_v13 = vld [vmem:[%s1304_s1 + $0x10] sm:$0xff]  ;;  %s768_s11 = smov [#allocation2]   ;;  %s648_s15 = sshll.u32 %s1311_s8, 4  ;;  %s649_s15 = int_to_ptr.hbm [resolvable:$true] %s648_s15 }
   0xd   :  { %683 = vmatpush.msra.mxu2 %v104_v5  ;;  %684 = vmatpush.msra.mxu3 %v104_v5  ;;  %v95_v14 = vld [vmem:[%s1304_s1 + $0x8] sm:$0xff]  ;;  %v94_v15 = vld [vmem:[%s1304_s1] sm:$0xff]  ;;  %v49_v17 = vld [vmem:[%s1303_s0 + $0x98] sm:$0xff]  ;;  %s646_s12 = sshll.u32 %s768_s11, 4  ;;  %s647_s12 = int_to_ptr.vmem [resolvable:$true] %s646_s12 }
   0xe   :  { %120 = vmatpush.msra.mxu0 %v103_v6  ;;  %685 = vmatpush.msra.mxu1 %v103_v6  ;;  %v30_v16 = vld [vmem:[%s1303_s0] sm:$0xff]  ;;  %v61_v18 = vld [vmem:[%s1303_s0 + $0xf8] sm:$0xff]  ;;  %v31_v20 = vld [vmem:[%s1303_s0 + $0x8] sm:$0xff] }
   0xf   :  { %686 = vmatpush.msra.mxu2 %v103_v6  ;;  %687 = vmatpush.msra.mxu3 %v103_v6  ;;  %v77_v19 = vld [vmem:[%s1303_s0 + $0x178] sm:$0xff]  ;;  %v50_v21 = vld [vmem:[%s1303_s0 + $0xa0] sm:$0xff]  ;;  %v32_v24 = vld [vmem:[%s1303_s0 + $0x10] sm:$0xff] }
  0x10   :  { %121 = vmatpush.msra.mxu0 %v102_v7  ;;  %688 = vmatpush.msra.mxu1 %v102_v7  ;;  %v62_v22 = vld [vmem:[%s1303_s0 + $0x100] sm:$0xff]  ;;  %v51_v25 = vld [vmem:[%s1303_s0 + $0xa8] sm:$0xff]  ;;  %v33_v28 = vld [vmem:[%s1303_s0 + $0x18] sm:$0xff] }
  0x11   :  { %689 = vmatpush.msra.mxu2 %v102_v7  ;;  %690 = vmatpush.msra.mxu3 %v102_v7  ;;  %v78_v23 = vld [vmem:[%s1303_s0 + $0x180] sm:$0xff]  ;;  %v63_v26 = vld [vmem:[%s1303_s0 + $0x108] sm:$0xff]  ;;  %v52_v29 = vld [vmem:[%s1303_s0 + $0xb0] sm:$0xff] }
  0x12   :  { %122 = vmatpush.msra.mxu0 %v101_v8  ;;  %691 = vmatpush.msra.mxu1 %v101_v8  ;;  %v79_v27 = vld [vmem:[%s1303_s0 + $0x188] sm:$0xff]  ;;  %v64_v30 = vld [vmem:[%s1303_s0 + $0x110] sm:$0xff]  ;;  %v34_v32 = vld [vmem:[%s1303_s0 + $0x20] sm:$0xff] }
  0x13   :  { %692 = vmatpush.msra.mxu2 %v101_v8  ;;  %693 = vmatpush.msra.mxu3 %v101_v8  ;;  %v80_v31 = vld [vmem:[%s1303_s0 + $0x190] sm:$0xff]  ;;  %v53_v33 = vld [vmem:[%s1303_s0 + $0xb8] sm:$0xff]  ;;  %v35_v36 = vld [vmem:[%s1303_s0 + $0x28] sm:$0xff] }
  0x14   :  { %123 = vmatpush.msra.mxu0 %v100_v9  ;;  %694 = vmatpush.msra.mxu1 %v100_v9  ;;  %v65_v34 = vld [vmem:[%s1303_s0 + $0x118] sm:$0xff]  ;;  %v54_v37 = vld [vmem:[%s1303_s0 + $0xc0] sm:$0xff]  ;;  %v36_v40 = vld [vmem:[%s1303_s0 + $0x30] sm:$0xff] }
  0x15   :  { %695 = vmatpush.msra.mxu2 %v100_v9  ;;  %696 = vmatpush.msra.mxu3 %v100_v9  ;;  %v81_v35 = vld [vmem:[%s1303_s0 + $0x198] sm:$0xff]  ;;  %v66_v38 = vld [vmem:[%s1303_s0 + $0x120] sm:$0xff]  ;;  %v55_v41 = vld [vmem:[%s1303_s0 + $0xc8] sm:$0xff] }
  0x16   :  { %124 = vmatpush.msra.mxu0 %v99_v10  ;;  %697 = vmatpush.msra.mxu1 %v99_v10  ;;  %v82_v39 = vld [vmem:[%s1303_s0 + $0x1a0] sm:$0xff]  ;;  %v67_v42 = vld [vmem:[%s1303_s0 + $0x128] sm:$0xff]  ;;  %v37_v44 = vld [vmem:[%s1303_s0 + $0x38] sm:$0xff] }
  0x17   :  { %698 = vmatpush.msra.mxu2 %v99_v10  ;;  %699 = vmatpush.msra.mxu3 %v99_v10  ;;  %v83_v43 = vld [vmem:[%s1303_s0 + $0x1a8] sm:$0xff]  ;;  %v56_v45 = vld [vmem:[%s1303_s0 + $0xd0] sm:$0xff]  ;;  %v38_v48 = vld [vmem:[%s1303_s0 + $0x40] sm:$0xff] }
  0x18   :  { %125 = vmatpush.msra.mxu0 %v98_v11  ;;  %700 = vmatpush.msra.mxu1 %v98_v11  ;;  %v68_v46 = vld [vmem:[%s1303_s0 + $0x130] sm:$0xff]  ;;  %v57_v49 = vld [vmem:[%s1303_s0 + $0xd8] sm:$0xff]  ;;  %v39_v52 = vld [vmem:[%s1303_s0 + $0x48] sm:$0xff] }
  0x19   :  { %701 = vmatpush.msra.mxu2 %v98_v11  ;;  %702 = vmatpush.msra.mxu3 %v98_v11  ;;  %v84_v47 = vld [vmem:[%s1303_s0 + $0x1b0] sm:$0xff]  ;;  %v69_v50 = vld [vmem:[%s1303_s0 + $0x138] sm:$0xff]  ;;  %v58_v53 = vld [vmem:[%s1303_s0 + $0xe0] sm:$0xff] }
  0x1a   :  { %126 = vmatpush.msra.mxu0 %v97_v12  ;;  %703 = vmatpush.msra.mxu1 %v97_v12  ;;  %v85_v51 = vld [vmem:[%s1303_s0 + $0x1b8] sm:$0xff]  ;;  %v70_v54 = vld [vmem:[%s1303_s0 + $0x140] sm:$0xff]  ;;  %v40_v56 = vld [vmem:[%s1303_s0 + $0x50] sm:$0xff] }
  0x1b   :  { %704 = vmatpush.msra.mxu2 %v97_v12  ;;  %705 = vmatpush.msra.mxu3 %v97_v12  ;;  %v86_v55 = vld [vmem:[%s1303_s0 + $0x1c0] sm:$0xff]  ;;  %v59_v57 = vld [vmem:[%s1303_s0 + $0xe8] sm:$0xff]  ;;  %v41_v60 = vld [vmem:[%s1303_s0 + $0x58] sm:$0xff] }
  0x1c   :  { %127 = vmatpush.msra.mxu0 %v96_v13  ;;  %706 = vmatpush.msra.mxu1 %v96_v13  ;;  %v71_v58 = vld [vmem:[%s1303_s0 + $0x148] sm:$0xff]  ;;  %v60_v61 = vld [vmem:[%s1303_s0 + $0xf0] sm:$0xff]  ;;  %v42_v0 = vld [vmem:[%s1303_s0 + $0x60] sm:$0xff] }
  0x1d   :  { %707 = vmatpush.msra.mxu2 %v96_v13  ;;  %708 = vmatpush.msra.mxu3 %v96_v13  ;;  %v87_v59 = vld [vmem:[%s1303_s0 + $0x1c8] sm:$0xff]  ;;  %v72_v62 = vld [vmem:[%s1303_s0 + $0x150] sm:$0xff]  ;;  %v73_v1 = vld [vmem:[%s1303_s0 + $0x158] sm:$0xff] }
  0x1e   :  { %128 = vmatpush.msra.mxu0 %v95_v14  ;;  %709 = vmatpush.msra.mxu1 %v95_v14  ;;  %v88_v63 = vld [vmem:[%s1303_s0 + $0x1d0] sm:$0xff]  ;;  %v89_v2 = vld [vmem:[%s1303_s0 + $0x1d8] sm:$0xff]  ;;  %v43_v3 = vld [vmem:[%s1303_s0 + $0x68] sm:$0xff] }
  0x1f   :  { %710 = vmatpush.msra.mxu2 %v95_v14  ;;  %711 = vmatpush.msra.mxu3 %v95_v14  ;;  %v74_v4 = vld [vmem:[%s1303_s0 + $0x160] sm:$0xff]  ;;  %v44_v6 = vld [vmem:[%s1303_s0 + $0x70] sm:$0xff]  ;;  %v75_v7 = vld [vmem:[%s1303_s0 + $0x168] sm:$0xff] }
  0x20   :  { %129 = vmatpush.msra.mxu0 %v94_v15  ;;  %712 = vmatpush.msra.mxu1 %v94_v15  ;;  %v90_v5 = vld [vmem:[%s1303_s0 + $0x1e0] sm:$0xff]  ;;  %v91_v8 = vld [vmem:[%s1303_s0 + $0x1e8] sm:$0xff]  ;;  %v45_v9 = vld [vmem:[%s1303_s0 + $0x78] sm:$0xff] }
  0x21   :  { %713 = vmatpush.msra.mxu2 %v94_v15  ;;  %130 = vmatmul.f32.vlgmr.msra.gmra.mxu0 %v30_v16  ;;  %v76_v10 = vld [vmem:[%s1303_s0 + $0x170] sm:$0xff]  ;;  %v46_v13 = vld [vmem:[%s1303_s0 + $0x80] sm:$0xff] }
  0x22   :  { %187 = vmatmul.f32.vlgmr.msra.gmra.mxu1 %v49_v17  ;;  %223 = vmatmul.f32.vlgmr.msra.gmra.mxu2 %v61_v18  ;;  %v92_v11 = vld [vmem:[%s1303_s0 + $0x1f0] sm:$0xff]  ;;  %v1055_v16 = vld [vmem:[%s1305_s2] ss:$0 sm:$0xff] }
  0x23   :  { %714 = vmatpush.msra.mxu3 %v94_v15  ;;  %v93_v15 = vld [vmem:[%s1303_s0 + $0x1f8] sm:$0xff] }
  0x24   :  { %271 = vmatmul.f32.vlgmr.msra.gmra.mxu3 %v77_v19 }
  0x29   :  { %133 = vmatmul.f32.gmra.mxu0 %v31_v20  ;;  %v47_v20 = vld [vmem:[%s1303_s0 + $0x88] sm:$0xff] }
  0x2a   :  { %190 = vmatmul.f32.gmra.mxu1 %v50_v21  ;;  %226 = vmatmul.f32.gmra.mxu2 %v62_v22 }
  0x2c   :  { %274 = vmatmul.f32.gmra.mxu3 %v78_v23 }
  0x31   :  { %136 = vmatmul.f32.gmra.mxu0 %v32_v24 }
  0x32   :  { %193 = vmatmul.f32.gmra.mxu1 %v51_v25  ;;  %229 = vmatmul.f32.gmra.mxu2 %v63_v26 }
  0x34   :  { %277 = vmatmul.f32.gmra.mxu3 %v79_v27 }
  0x39   :  { %139 = vmatmul.f32.gmra.mxu0 %v33_v28  ;;  %v48_v28 = vld [vmem:[%s1303_s0 + $0x90] sm:$0xff] }
  0x3a   :  { %196 = vmatmul.f32.gmra.mxu1 %v52_v29  ;;  %232 = vmatmul.f32.gmra.mxu2 %v64_v30 }
  0x3c   :  { %280 = vmatmul.f32.gmra.mxu3 %v80_v31 }
  0x41   :  { %142 = vmatmul.f32.gmra.mxu0 %v34_v32 }
  0x42   :  { %199 = vmatmul.f32.gmra.mxu1 %v53_v33  ;;  %235 = vmatmul.f32.gmra.mxu2 %v65_v34 }
  0x44   :  { %283 = vmatmul.f32.gmra.mxu3 %v81_v35 }
  0x49   :  { %145 = vmatmul.f32.gmra.mxu0 %v35_v36 }
  0x4a   :  { %202 = vmatmul.f32.gmra.mxu1 %v54_v37  ;;  %238 = vmatmul.f32.gmra.mxu2 %v66_v38 }
  0x4c   :  { %286 = vmatmul.f32.gmra.mxu3 %v82_v39 }
  0x51   :  { %148 = vmatmul.f32.gmra.mxu0 %v36_v40 }
  0x52   :  { %205 = vmatmul.f32.gmra.mxu1 %v55_v41  ;;  %241 = vmatmul.f32.gmra.mxu2 %v67_v42 }
  0x54   :  { %289 = vmatmul.f32.gmra.mxu3 %v83_v43 }
  0x59   :  { %151 = vmatmul.f32.gmra.mxu0 %v37_v44 }
  0x5a   :  { %208 = vmatmul.f32.gmra.mxu1 %v56_v45  ;;  %244 = vmatmul.f32.gmra.mxu2 %v68_v46 }
  0x5c   :  { %292 = vmatmul.f32.gmra.mxu3 %v84_v47 }
  0x61   :  { %154 = vmatmul.f32.gmra.mxu0 %v38_v48 }
  0x62   :  { %211 = vmatmul.f32.gmra.mxu1 %v57_v49  ;;  %247 = vmatmul.f32.gmra.mxu2 %v69_v50 }
  0x64   :  { %295 = vmatmul.f32.gmra.mxu3 %v85_v51 }
  0x69   :  { %157 = vmatmul.f32.gmra.mxu0 %v39_v52 }
  0x6a   :  { %214 = vmatmul.f32.gmra.mxu1 %v58_v53  ;;  %250 = vmatmul.f32.gmra.mxu2 %v70_v54 }
  0x6c   :  { %298 = vmatmul.f32.gmra.mxu3 %v86_v55 }
  0x71   :  { %160 = vmatmul.f32.gmra.mxu0 %v40_v56 }
  0x72   :  { %217 = vmatmul.f32.gmra.mxu1 %v59_v57  ;;  %253 = vmatmul.f32.gmra.mxu2 %v71_v58 }
  0x74   :  { %301 = vmatmul.f32.gmra.mxu3 %v87_v59 }
  0x79   :  { %163 = vmatmul.f32.gmra.mxu0 %v41_v60 }
  0x7a   :  { %220 = vmatmul.f32.gmra.mxu1 %v60_v61  ;;  %256 = vmatmul.f32.gmra.mxu2 %v72_v62 }
  0x7c   :  { %304 = vmatmul.f32.gmra.mxu3 %v88_v63 }
  0x81   :  { %166 = vmatmul.f32.gmra.mxu0 %v42_v0 }
  0x82   :  { %259 = vmatmul.f32.gmra.mxu2 %v73_v1 }
  0x84   :  { %307 = vmatmul.f32.gmra.mxu3 %v89_v2 }
  0x89   :  { %169 = vmatmul.f32.gmra.mxu0 %v43_v3 }
  0x8a   :  { %262 = vmatmul.f32.gmra.mxu2 %v74_v4 }
  0x8c   :  { %310 = vmatmul.f32.gmra.mxu3 %v90_v5 }
  0x91   :  { %172 = vmatmul.f32.gmra.mxu0 %v44_v6 }
  0x92   :  { %265 = vmatmul.f32.gmra.mxu2 %v75_v7 }
  0x94   :  { %313 = vmatmul.f32.gmra.mxu3 %v91_v8 }
  0x99   :  { %175 = vmatmul.f32.gmra.mxu0 %v45_v9 }
  0x9a   :  { %268 = vmatmul.f32.gmra.mxu2 %v76_v10 }
  0x9c   :  { %316 = vmatmul.f32.gmra.mxu3 %v92_v11 }
  0x9e   :  { %v1042_v12 = vpop.f32.mrf.mxu0 }
  0x9f   :  { %v1047_v14 = vpop.f32.mrf.mxu1 }
  0xa1   :  { %178 = vmatmul.f32.gmra.mxu0 %v46_v13 }
  0xa4   :  { %319 = vmatmul.f32.gmra.mxu3 %v93_v15 }
  0xa5   :  { %v224_v17 = vpop.f32.mrf.mxu2 }
  0xa6   :  { %v225_v18 = vadd.f32 %v1055_v16, %v224_v17  ;;  %v1058_v19 = vpop.f32.mrf.mxu0 }
  0xa7   :  { %v1063_v21 = vpop.f32.mrf.mxu1  ;;  %v272_v22 = vpop.f32.mrf.mxu3 }
  0xa8   :  { %v354_v23 = vmax.f32 %v225_v18, 0.0  ;;  %v273_v24 = vadd.f32 %v1055_v16, %v272_v22 }
  0xa9   :  { %181 = vmatmul.f32.gmra.mxu0 %v47_v20 }
  0xaa   :  { %418 = vmatpush.msrb.mxu2 %v354_v23  ;;  %v370_v25 = vmax.f32 %v273_v24, 0.0 }
  0xac   :  { %438 = vmatpush.msrb.mxu3 %v370_v25 }
  0xad   :  { %v1066_v26 = vpop.f32.mrf.mxu2 }
  0xae   :  { %v1068_v27 = vpop.f32.mrf.mxu0 }
  0xaf   :  { %v1073_v29 = vpop.f32.mrf.mxu1  ;;  %v1075_v30 = vpop.f32.mrf.mxu3 }
  0xb1   :  { %184 = vmatmul.f32.gmra.mxu0 %v48_v28 }
  0xb5   :  { %v1077_v31 = vpop.f32.mrf.mxu2 }
  0xb6   :  { %v1079_v32 = vpop.f32.mrf.mxu0 }
  0xb7   :  { %v197_v33 = vpop.f32.mrf.mxu1  ;;  %v1081_v34 = vpop.f32.mrf.mxu3 }
  0xb8   :  { %v198_v28 = vadd.f32 %v1055_v16, %v197_v33 }
  0xbd   :  { %v1083_v35 = vpop.f32.mrf.mxu2 }
  0xbe   :  { %v1085_v36 = vpop.f32.mrf.mxu0 }
  0xbf   :  { %v200_v37 = vpop.f32.mrf.mxu1  ;;  %v1087_v38 = vpop.f32.mrf.mxu3 }
  0xc0   :  { %v201_v24 = vadd.f32 %v1055_v16, %v200_v37  ;;  %v189_v37 = vadd.f32 %v1055_v16, %v1047_v14 }
  0xc5   :  { %v1089_v39 = vpop.f32.mrf.mxu2 }
  0xc6   :  { %v1091_v40 = vpop.f32.mrf.mxu0 }
  0xc7   :  { %v203_v41 = vpop.f32.mrf.mxu1  ;;  %v1093_v42 = vpop.f32.mrf.mxu3 }
  0xc8   :  { %v204_v22 = vadd.f32 %v1055_v16, %v203_v41  ;;  %v192_v41 = vadd.f32 %v1055_v16, %v1063_v21 }
  0xcd   :  { %v1095_v43 = vpop.f32.mrf.mxu2 }
  0xce   :  { %v1097_v44 = vpop.f32.mrf.mxu0 }
  0xcf   :  { %v206_v45 = vpop.f32.mrf.mxu1  ;;  %v1099_v46 = vpop.f32.mrf.mxu3 }
  0xd0   :  { %v207_v13 = vadd.f32 %v1055_v16, %v206_v45 }
  0xd2   :  { %v348_v23 = vmax.f32 %v207_v13, 0.0 }
  0xd5   :  { %v1101_v47 = vpop.f32.mrf.mxu2 }
  0xd6   :  { %v1103_v48 = vpop.f32.mrf.mxu0 }
  0xd7   :  { %v209_v49 = vpop.f32.mrf.mxu1  ;;  %v1105_v50 = vpop.f32.mrf.mxu3 }
  0xd8   :  { %v210_v9 = vadd.f32 %v1055_v16, %v209_v49  ;;  %v347_v49 = vmax.f32 %v204_v22, 0.0 }
  0xda   :  { %v349_v20 = vmax.f32 %v210_v9, 0.0 }
  0xdd   :  { %v1107_v51 = vpop.f32.mrf.mxu2 }
  0xde   :  { %v1109_v52 = vpop.f32.mrf.mxu0 }
  0xdf   :  { %v212_v53 = vpop.f32.mrf.mxu1  ;;  %v1111_v54 = vpop.f32.mrf.mxu3 }
  0xe0   :  { %v213_v6 = vadd.f32 %v1055_v16, %v212_v53 }
  0xe2   :  { %v350_v15 = vmax.f32 %v213_v6, 0.0  ;;  %v342_v6 = vmax.f32 %v189_v37, 0.0 }
  0xe5   :  { %v1113_v55 = vpop.f32.mrf.mxu2 }
  0xe6   :  { %v1115_v56 = vpop.f32.mrf.mxu0 }
  0xe7   :  { %v215_v57 = vpop.f32.mrf.mxu1  ;;  %v1117_v58 = vpop.f32.mrf.mxu3  ;;  %v159_v37 = vadd.f32 %v1055_v16, %v1115_v56  ;;  %v153_v56 = vadd.f32 %v1055_v16, %v1103_v48  ;;  %v147_v48 = vadd.f32 %v1055_v16, %v1091_v40  ;;  %v141_v40 = vadd.f32 %v1055_v16, %v1079_v32 }
  0xe8   :  { %v216_v4 = vadd.f32 %v1055_v16, %v215_v57  ;;  %v195_v57 = vadd.f32 %v1055_v16, %v1073_v29 }
  0xea   :  { %v351_v10 = vmax.f32 %v216_v4, 0.0  ;;  %v343_v4 = vmax.f32 %v192_v41, 0.0 }
  0xed   :  { %v1119_v59 = vpop.f32.mrf.mxu2 }
  0xee   :  { %v1121_v60 = vpop.f32.mrf.mxu0 }
  0xef   :  { %v218_v61 = vpop.f32.mrf.mxu1  ;;  %v1123_v62 = vpop.f32.mrf.mxu3 }
  0xf0   :  { %v219_v0 = vadd.f32 %v1055_v16, %v218_v61  ;;  %v346_v61 = vmax.f32 %v201_v24, 0.0 }
  0xf2   :  { %v352_v7 = vmax.f32 %v219_v0, 0.0  ;;  %v345_v0 = vmax.f32 %v198_v28, 0.0 }
  0xf5   :  { %v1125_v63 = vpop.f32.mrf.mxu2 }
  0xf6   :  { %v164_v1 = vpop.f32.mrf.mxu0 }
  0xf7   :  { %v221_v2 = vpop.f32.mrf.mxu1  ;;  %v1128_v3 = vpop.f32.mrf.mxu3 }
  0xf8   :  { %v222_v5 = vadd.f32 %v1055_v16, %v221_v2  ;;  %v344_v2 = vmax.f32 %v195_v57, 0.0 }
  0xfa   :  { %v353_v8 = vmax.f32 %v222_v5, 0.0 }
  0xfc   :  { %419 = vmatpush.msrb.mxu2 %v353_v8 }
  0xfd   :  { %v1134_v11 = vpop.f32.mrf.mxu2 }
  0xfe   :  { %420 = vmatpush.msrb.mxu2 %v352_v7  ;;  %v167_v17 = vpop.f32.mrf.mxu0 }
  0xff   :  { %v1137_v18 = vpop.f32.mrf.mxu3  ;;  %v168_v13 = vadd.f32 %v1055_v16, %v167_v17 }
 0x100   :  { %421 = vmatpush.msrb.mxu2 %v351_v10 }
 0x101   :  { %v335_v17 = vmax.f32 %v168_v13, 0.0  ;;  %v330_v13 = vmax.f32 %v153_v56, 0.0  ;;  %v231_v56 = vadd.f32 %v1055_v16, %v1077_v31 }
 0x102   :  { %422 = vmatpush.msrb.mxu2 %v350_v15 }
 0x103   :  { %v356_v31 = vmax.f32 %v231_v56, 0.0 }
 0x104   :  { %423 = vmatpush.msrb.mxu2 %v349_v20 }
 0x105   :  { %v260_v25 = vpop.f32.mrf.mxu2 }
 0x106   :  { %424 = vmatpush.msrb.mxu2 %v348_v23  ;;  %v170_v45 = vpop.f32.mrf.mxu0  ;;  %v165_v23 = vadd.f32 %v1055_v16, %v164_v1  ;;  %v261_v1 = vadd.f32 %v1055_v16, %v260_v25  ;;  %v332_v25 = vmax.f32 %v159_v37, 0.0  ;;  %v326_v37 = vmax.f32 %v141_v40, 0.0 }
 0x107   :  { %v1142_v53 = vpop.f32.mrf.mxu3  ;;  %v171_v10 = vadd.f32 %v1055_v16, %v170_v45  ;;  %v162_v45 = vadd.f32 %v1055_v16, %v1121_v60  ;;  %v387_v60 = vld [vmem:[%s1306_s3] sm:$0xff] }
 0x108   :  { %425 = vmatpush.msrb.mxu2 %v347_v49  ;;  %389 = vst [vmem:[#allocation1] ss:$4 sm:$0xff] %v387_v60 }
 0x109   :  { %v336_v24 = vmax.f32 %v171_v10, 0.0 }
 0x10a   :  { %426 = vmatpush.msrb.mxu2 %v346_v61 }
 0x10c   :  { %427 = vmatpush.msrb.mxu2 %v345_v0 }
 0x10d   :  { %v263_v33 = vpop.f32.mrf.mxu2 }
 0x10e   :  { %428 = vmatpush.msrb.mxu2 %v344_v2  ;;  %v173_v5 = vpop.f32.mrf.mxu0  ;;  %v264_v49 = vadd.f32 %v1055_v16, %v263_v33  ;;  %v334_v2 = vmax.f32 %v165_v23, 0.0  ;;  %v156_v33 = vadd.f32 %v1055_v16, %v1109_v52  ;;  %v255_v52 = vadd.f32 %v1055_v16, %v1125_v63 }
 0x10f   :  { %v1150_v7 = vpop.f32.mrf.mxu3  ;;  %v174_v21 = vadd.f32 %v1055_v16, %v173_v5  ;;  %v333_v5 = vmax.f32 %v162_v45, 0.0  ;;  %v249_v63 = vadd.f32 %v1055_v16, %v1113_v55  ;;  %v243_v55 = vadd.f32 %v1055_v16, %v1101_v47 }
 0x110   :  { %429 = vmatpush.msrb.mxu2 %v343_v4  ;;  %v367_v4 = vmax.f32 %v264_v49, 0.0  ;;  %v331_v10 = vmax.f32 %v156_v33, 0.0  ;;  %v135_v47 = vadd.f32 %v1055_v16, %v1058_v19  ;;  %v132_v33 = vadd.f32 %v1055_v16, %v1042_v12 }
 0x111   :  { %v337_v15 = vmax.f32 %v174_v21, 0.0  ;;  %v362_v49 = vmax.f32 %v249_v63, 0.0  ;;  %v234_v19 = vadd.f32 %v1055_v16, %v1083_v35  ;;  %v228_v35 = vadd.f32 %v1055_v16, %v1066_v26 }
 0x112   :  { %430 = vmatpush.msrb.mxu2 %v342_v6  ;;  %v258_v6 = vadd.f32 %v1055_v16, %v1134_v11  ;;  %v252_v11 = vadd.f32 %v1055_v16, %v1119_v59  ;;  %v246_v59 = vadd.f32 %v1055_v16, %v1107_v51  ;;  %v309_v26 = vadd.f32 %v1055_v16, %v1142_v53 }
 0x114   :  { %v363_v23 = vmax.f32 %v252_v11, 0.0 }
 0x115   :  { %v266_v29 = vpop.f32.mrf.mxu2 }
 0x116   :  { %v176_v8 = vpop.f32.mrf.mxu0  ;;  %v267_v22 = vadd.f32 %v1055_v16, %v266_v29 }
 0x117   :  { %v177_v9 = vadd.f32 %v1055_v16, %v176_v8  ;;  %v1156_v20 = vpop.f32.mrf.mxu3  ;;  %v366_v8 = vmax.f32 %v261_v1, 0.0 }
 0x118   :  { %v368_v41 = vmax.f32 %v267_v22, 0.0 }
 0x119   :  { %v338_v14 = vmax.f32 %v177_v9, 0.0  ;;  %v150_v9 = vadd.f32 %v1055_v16, %v1097_v44  ;;  %v144_v44 = vadd.f32 %v1055_v16, %v1085_v36 }
 0x11b   :  { %398 = vmatpush.msrb.mxu1 %v338_v14  ;;  %v365_v14 = vmax.f32 %v258_v6, 0.0  ;;  %v329_v22 = vmax.f32 %v150_v9, 0.0  ;;  %v327_v45 = vmax.f32 %v144_v44, 0.0  ;;  %v324_v6 = vmax.f32 %v135_v47, 0.0 }
 0x11c   :  { %v315_v9 = vadd.f32 %v1055_v16, %v1156_v20  ;;  %v392_v20 = vld.sshfl [vmem:[#allocation1 + $0x10] sm:$0xff pattern:$0x73625140]  ;;  %v300_v44 = vadd.f32 %v1055_v16, %v1123_v62  ;;  %v288_v62 = vadd.f32 %v1055_v16, %v1099_v46  ;;  %v276_v46 = vadd.f32 %v1055_v16, %v1075_v30  ;;  %v478_v30 = vld [vmem:[%s1307_s4] sm:$0xff] }
 0x11d   :  { %v269_v28 = vpop.f32.mrf.mxu2  ;;  %399 = vmatpush.msrb.mxu1 %v337_v15  ;;  %v364_v15 = vmax.f32 %v255_v52, 0.0 }
 0x11e   :  { %v270_v57 = vadd.f32 %v1055_v16, %v269_v28  ;;  %v179_v61 = vpop.f32.mrf.mxu0 }
 0x11f   :  { %400 = vmatpush.msrb.mxu1 %v336_v24  ;;  %v1176_v29 = vpop.f32.mrf.mxu3  ;;  %v328_v24 = vmax.f32 %v147_v48, 0.0  ;;  %v180_v51 = vadd.f32 %v1055_v16, %v179_v61  ;;  %v384_v48 = vmax.f32 %v315_v9, 0.0 }
 0x120   :  { %v369_v0 = vmax.f32 %v270_v57, 0.0  ;;  %v138_v57 = vadd.f32 %v1055_v16, %v1068_v27  ;;  %v237_v27 = vadd.f32 %v1055_v16, %v1089_v39  ;;  %v391_v39 = vld.sshfl [vmem:[#allocation1 + $0x8] sm:$0xff pattern:$0x73625140]  ;;  %v318_v12 = vadd.f32 %v1055_v16, %v1176_v29 }
 0x121   :  { %401 = vmatpush.msrb.mxu1 %v335_v17  ;;  %v312_v29 = vadd.f32 %v1055_v16, %v1150_v7  ;;  %v303_v7 = vadd.f32 %v1055_v16, %v1128_v3  ;;  %v291_v3 = vadd.f32 %v1055_v16, %v1105_v50  ;;  %v279_v50 = vadd.f32 %v1055_v16, %v1081_v34  ;;  %v480_v34 = vld [vmem:[%s1307_s4 + $0x10] sm:$0xff] }
 0x122   :  { %439 = vmatpush.msrb.mxu3 %v369_v0  ;;  %v361_v0 = vmax.f32 %v246_v59, 0.0  ;;  %v385_v11 = vmax.f32 %v318_v12, 0.0 }
 0x123   :  { %402 = vmatpush.msrb.mxu1 %v334_v2  ;;  %v383_v63 = vmax.f32 %v312_v29, 0.0  ;;  %v380_v59 = vmax.f32 %v303_v7, 0.0  ;;  %v660_v29 = vld [vmem:[%s1307_s4 + $0x28] sm:$0xff] }
 0x124   :  { %440 = vmatpush.msrb.mxu3 %v368_v41  ;;  %v240_v41 = vadd.f32 %v1055_v16, %v1095_v43  ;;  %v325_v43 = vmax.f32 %v138_v57, 0.0  ;;  %v372_v57 = vmax.f32 %v279_v50, 0.0 }
 0x125   :  { %403 = vmatpush.msrb.mxu1 %v333_v5  ;;  %v339_v5 = vmax.f32 %v180_v51, 0.0 }
 0x126   :  { %441 = vmatpush.msrb.mxu3 %v367_v4  ;;  %v182_v21 = vpop.f32.mrf.mxu0  ;;  %v360_v4 = vmax.f32 %v243_v55, 0.0  ;;  %v359_v60 = vmax.f32 %v240_v41, 0.0  ;;  %v375_v55 = vmax.f32 %v288_v62, 0.0 }
 0x127   :  { %404 = vmatpush.msrb.mxu1 %v332_v25  ;;  %v183_v28 = vadd.f32 %v1055_v16, %v182_v21  ;;  %v320_v17 = vpop.f32.mrf.mxu3  ;;  %v358_v25 = vmax.f32 %v237_v27, 0.0  ;;  %v357_v21 = vmax.f32 %v234_v19, 0.0 }
 0x128   :  { %442 = vmatpush.msrb.mxu3 %v366_v8  ;;  %v321_v61 = vadd.f32 %v1055_v16, %v320_v17  ;;  %v323_v8 = vmax.f32 %v132_v33, 0.0 }
 0x129   :  { %405 = vmatpush.msrb.mxu1 %v331_v10  ;;  %v340_v2 = vmax.f32 %v183_v28, 0.0  ;;  %v390_v10 = vld.sshfl [vmem:[#allocation1] sm:$0xff pattern:$0x73625140]  ;;  %v376_v28 = vmax.f32 %v291_v3, 0.0 }
 0x12a   :  { %443 = vmatpush.msrb.mxu3 %v365_v14  ;;  %v386_v52 = vmax.f32 %v321_v61, 0.0  ;;  %v355_v14 = vmax.f32 %v228_v35, 0.0 }
 0x12b   :  { %406 = vmatpush.msrb.mxu1 %v330_v13  ;;  %v306_v13 = vadd.f32 %v1055_v16, %v1137_v18  ;;  %v294_v18 = vadd.f32 %v1055_v16, %v1111_v54  ;;  %v282_v54 = vadd.f32 %v1055_v16, %v1087_v38  ;;  %v481_v38 = vld [vmem:[%s1307_s4 + $0x18] sm:$0xff] }
 0x12c   :  { %444 = vmatpush.msrb.mxu3 %v364_v15  ;;  %v382_v15 = vmax.f32 %v309_v26, 0.0 }
 0x12d   :  { %407 = vmatpush.msrb.mxu1 %v329_v22  ;;  %v381_v53 = vmax.f32 %v306_v13, 0.0  ;;  %v297_v22 = vadd.f32 %v1055_v16, %v1117_v58  ;;  %v285_v58 = vadd.f32 %v1055_v16, %v1093_v42  ;;  %v371_v42 = vmax.f32 %v276_v46, 0.0  ;;  %v609_v46 = vld [vmem:[%s1309_s6 + $0x10] sm:$0xff] }
 0x12e   :  { %445 = vmatpush.msrb.mxu3 %v363_v23  ;;  %v185_v36 = vpop.f32.mrf.mxu0  ;;  %v379_v23 = vmax.f32 %v300_v44, 0.0 }
 0x12f   :  { %408 = vmatpush.msrb.mxu1 %v328_v24  ;;  %v186_v32 = vadd.f32 %v1055_v16, %v185_v36  ;;  %v378_v40 = vmax.f32 %v297_v22, 0.0  ;;  %v377_v24 = vmax.f32 %v294_v18, 0.0  ;;  %v373_v36 = vmax.f32 %v282_v54, 0.0  ;;  %v479_v16 = vld [vmem:[%s1307_s4 + $0x8] sm:$0xff] }
 0x130   :  { %446 = vmatpush.msrb.mxu3 %v362_v49  ;;  %v374_v49 = vmax.f32 %v285_v58, 0.0 }
 0x131   :  { %409 = vmatpush.msrb.mxu1 %v327_v45  ;;  %v341_v1 = vmax.f32 %v186_v32, 0.0  ;;  %v393_v45 = vld.sshfl [vmem:[#allocation1 + $0x18] sm:$0xff pattern:$0x73625140] }
 0x132   :  { %447 = vmatpush.msrb.mxu3 %v361_v0 }
 0x133   :  { %410 = vmatpush.msrb.mxu1 %v326_v37  ;;  %431 = vmatpush.msrb.mxu2 %v341_v1 }
 0x134   :  { %448 = vmatpush.msrb.mxu3 %v360_v4 }
 0x135   :  { %411 = vmatpush.msrb.mxu1 %v325_v43  ;;  %432 = vmatpush.msrb.mxu2 %v340_v2  ;;  %v720_v2 = vld [vmem:[%s1308_s5] ss:$0 sm:$0xff] }
 0x136   :  { %449 = vmatpush.msrb.mxu3 %v359_v60 }
 0x137   :  { %412 = vmatpush.msrb.mxu1 %v324_v6  ;;  %433 = vmatpush.msrb.mxu2 %v339_v5 }
 0x138   :  { %450 = vmatpush.msrb.mxu3 %v358_v25  ;;  %434 = vmatmul.f32.vlgmr.msrb.gmra.mxu2 %v391_v39 }
 0x139   :  { %413 = vmatpush.msrb.mxu1 %v323_v8  ;;  %502 = vmatpush.msra.mxu2 %v481_v38 }
 0x13a   :  { %451 = vmatpush.msrb.mxu3 %v357_v21  ;;  %414 = vmatmul.f32.vlgmr.msrb.gmra.mxu1 %v390_v10  ;;  %v662_v10 = vld [vmem:[%s1307_s4 + $0x38] sm:$0xff] }
 0x13b   :  { %458 = vmatpush.msra.mxu1 %v386_v52  ;;  %503 = vmatpush.msra.mxu2 %v480_v34  ;;  %v722_v34 = vld [vmem:[%s1310_s7] ss:$0 sm:$0xff] }
 0x13c   :  { %452 = vmatpush.msrb.mxu3 %v356_v31  ;;  %v661_v31 = vld [vmem:[%s1307_s4 + $0x30] sm:$0xff] }
 0x13d   :  { %459 = vmatpush.msra.mxu1 %v385_v11  ;;  %504 = vmatpush.msra.mxu2 %v479_v16  ;;  %v659_v11 = vld [vmem:[%s1307_s4 + $0x20] sm:$0xff] }
 0x13e   :  { %453 = vmatpush.msrb.mxu3 %v355_v14 }
 0x13f   :  { %460 = vmatpush.msra.mxu1 %v384_v48  ;;  %454 = vmatmul.f32.vlgmr.msrb.gmra.mxu3 %v392_v20  ;;  %v721_v20 = vld [vmem:[%s1308_s5 + $0x1] ss:$0 sm:$0xff] }
 0x140   :  { %505 = vmatpush.msra.mxu2 %v478_v30  ;;  %568 = vmatpush.msra.mxu3 %v662_v10 }
 0x141   :  { %461 = vmatpush.msra.mxu1 %v383_v63 }
 0x142   :  { %569 = vmatpush.msra.mxu3 %v661_v31 }
 0x143   :  { %462 = vmatpush.msra.mxu1 %v382_v15 }
 0x144   :  { %570 = vmatpush.msra.mxu3 %v660_v29 }
 0x145   :  { %463 = vmatpush.msra.mxu1 %v381_v53 }
 0x146   :  { %571 = vmatpush.msra.mxu3 %v659_v11 }
 0x147   :  { %464 = vmatpush.msra.mxu1 %v380_v59 }
 0x149   :  { %465 = vmatpush.msra.mxu1 %v379_v23 }
 0x14b   :  { %466 = vmatpush.msra.mxu1 %v378_v40 }
 0x14d   :  { %467 = vmatpush.msra.mxu1 %v377_v24 }
 0x14f   :  { %468 = vmatpush.msra.mxu1 %v376_v28 }
 0x151   :  { %469 = vmatpush.msra.mxu1 %v375_v55 }
 0x153   :  { %470 = vmatpush.msra.mxu1 %v374_v49  ;;  %v610_v49 = vld [vmem:[%s1309_s6 + $0x18] sm:$0xff] }
 0x154   :  { %632 = vmatpush.msrb.mxu2 %v610_v49 }
 0x155   :  { %471 = vmatpush.msra.mxu1 %v373_v36  ;;  %v608_v36 = vld [vmem:[%s1309_s6 + $0x8] sm:$0xff] }
 0x156   :  { %633 = vmatpush.msrb.mxu2 %v609_v46 }
 0x157   :  { %472 = vmatpush.msra.mxu1 %v372_v57  ;;  %v607_v57 = vld [vmem:[%s1309_s6] sm:$0xff] }
 0x158   :  { %634 = vmatpush.msrb.mxu2 %v608_v36 }
 0x159   :  { %473 = vmatpush.msra.mxu1 %v371_v42 }
 0x15a   :  { %474 = vmatmul.f32.vlgmr.msra.gmra.mxu1 %v393_v45  ;;  %635 = vmatpush.msrb.mxu2 %v607_v57 }
 0x1b7   :  { %v415_v51 = vpop.f32.mrf.mxu1 }
 0x1bb   :  { %v435_v17 = vpop.f32.mrf.mxu2 }
 0x1bc   :  { %v436_v32 = vadd.f32 %v435_v17, %v415_v51 }
 0x1c2   :  { %v455_v41 = vpop.f32.mrf.mxu3 }
 0x1c3   :  { %v456_v0 = vadd.f32 %v455_v41, %v436_v32 }
 0x1d7   :  { %v475_v47 = vpop.f32.mrf.mxu1 }
 0x1d8   :  { %v476_v37 = vadd.f32 %v475_v47, %v456_v0 }
 0x1da   :  { %657 = vmatmul.msk.f32.vlgmr.msra.gmra.mxu2 %vm486_vm0, %v476_v37 }
 0x25d   :  { %v507_v1 = vpop.f32.mrf.mxu2 }
 0x25e   :  { %v508_v27 = vadd.f32 %v720_v2, %v507_v1 }
 0x260   :  { %723 = vtanh.f32 %v508_v27  ;;  %v658_v61 = vmul.f32 -1.442695, %v508_v27 }
 0x262   :  { %725 = vpow2.f32 %v658_v61 }
 0x266   :  { %v724_v4 = vpop.eup %723 }
 0x267   :  { %531 = vrot.lane.b32.xlu0 %v724_v4, %s765_s16 }
 0x268   :  { %v726_v33 = vpop.eup %725 }
 0x269   :  { %v513_v43 = vadd.f32 1.0, %v726_v33 }
 0x26b   :  { %727 = vrcp.f32 %v513_v43  ;;  %v525_v56 = vand.u32 2147483648, %v513_v43  ;;  %vm519_vm2 = vweird.f32 %v513_v43  ;;  %v523_v25 = vand.u32 2147483647, %v513_v43 }
 0x26d   :  { %v526_v52 = vor.u32 1.1754944e-38, %v525_v56  ;;  %vm524_vm4 = vcmp.eq.f32.partialorder %v523_v25, 8.507059e+37 }
 0x271   :  { %v728_v5 = vpop.eup %727 }
 0x272   :  { %v515_v19 = vmul.f32 %v728_v5, %v513_v43  ;;  %vm520_vm1 = vweird.f32 %v728_v5 }
 0x273   :  { %vm521_vm3 = vmor %vm519_vm2, %vm520_vm1 }
 0x274   :  { %v516_v60 = vsub.f32 1.0, %v515_v19 }
 0x276   :  { %v517_v6 = vmul.f32 %v728_v5, %v516_v60 }
 0x278   :  { %v518_v39 = vadd.f32 %v728_v5, %v517_v6 }
 0x27a   :  { %v522_v12 = vsel %vm521_vm3, %v728_v5, %v518_v39 }
 0x27b   :  { %v527_v35 = vsel %vm524_vm4, %v526_v52, %v522_v12 }
 0x2d9   :  { %v532_v8 = vpop.permute.xlu0 %531 }
 0x2da   :  { %v534_v21 = vmul.f32 %v532_v8, %v527_v35 }
 0x2dc   :  { %729 = vtanh.f32 %v534_v21 }
 0x2e2   :  { %v730_v9 = vpop.eup %729 }
 0x2e3   :  { %537 = vrot.lane.b32.xlu0 %v730_v9, %s766_s17 }
 0x355   :  { %v538_v14 = vpop.permute.xlu0 %537 }
 0x356   :  { %v540_v26 = vmul.f32 %v538_v14, %v527_v35 }
 0x358   :  { %552 = vrot.lane.b32.xlu1 %v540_v26, %s767_s25 }
 0x3ca   :  { %v553_v48 = vpop.permute.xlu1 %552 }
 0x3cb   :  { %664 = vmatmul.msk.f32.vlgmr.msra.gmra.mxu3 %vm486_vm0, %v553_v48 }
 0x44e   :  { %v573_v13 = vpop.f32.mrf.mxu3 }
 0x44f   :  { %v574_v63 = vadd.f32 %v721_v20, %v573_v13 }
 0x451   :  { %731 = vtanh.f32 %v574_v63  ;;  %v665_v15 = vmul.f32 -1.442695, %v574_v63 }
 0x453   :  { %733 = vpow2.f32 %v665_v15 }
 0x457   :  { %v732_v7 = vpop.eup %731 }
 0x458   :  { %597 = vrot.lane.b32.xlu1 %v732_v7, %s765_s16 }
 0x459   :  { %v734_v44 = vpop.eup %733 }
 0x45a   :  { %v579_v53 = vadd.f32 1.0, %v734_v44 }
 0x45c   :  { %735 = vrcp.f32 %v579_v53  ;;  %v591_v40 = vand.u32 2147483648, %v579_v53  ;;  %vm585_vm6 = vweird.f32 %v579_v53  ;;  %v589_v62 = vand.u32 2147483647, %v579_v53 }
 0x45e   :  { %v592_v58 = vor.u32 1.1754944e-38, %v591_v40  ;;  %vm590_vm8 = vcmp.eq.f32.partialorder %v589_v62, 8.507059e+37 }
 0x462   :  { %v736_v22 = vpop.eup %735 }
 0x463   :  { %v581_v59 = vmul.f32 %v736_v22, %v579_v53  ;;  %vm586_vm5 = vweird.f32 %v736_v22 }
 0x464   :  { %vm587_vm7 = vmor %vm585_vm6, %vm586_vm5 }
 0x465   :  { %v582_v18 = vsub.f32 1.0, %v581_v59 }
 0x467   :  { %v583_v23 = vmul.f32 %v736_v22, %v582_v18 }
 0x469   :  { %v584_v3 = vadd.f32 %v736_v22, %v583_v23 }
 0x46b   :  { %v588_v24 = vsel %vm587_vm7, %v736_v22, %v584_v3 }
 0x46c   :  { %v593_v54 = vsel %vm590_vm8, %v592_v58, %v588_v24 }
 0x4ca   :  { %v598_v28 = vpop.permute.xlu1 %597 }
 0x4cb   :  { %v600_v55 = vmul.f32 %v598_v28, %v593_v54 }
 0x4cd   :  { %737 = vtanh.f32 %v600_v55 }
 0x4d3   :  { %v738_v50 = vpop.eup %737 }
 0x4d4   :  { %603 = vrot.lane.b32.xlu2 %v738_v50, %s766_s17 }
 0x52e   :  { %v604_v42 = vpop.permute.xlu2 %603 }
 0x52f   :  { %v606_v45 = vmul.f32 %v604_v42, %v593_v54 }
 0x531   :  { %616 = vrot.lane.b32.xlu2 %v606_v45, %s767_s25 }
 0x58b   :  { %v617_v38 = vpop.permute.xlu2 %616 }
 0x58c   :  { %666 = vmatmul.msk.f32.vlgmr.msrb.gmra.mxu2 %vm486_vm0, %v617_v38 }
 0x60f   :  { %v637_v16 = vpop.f32.mrf.mxu2 }
 0x610   :  { %v638_v30 = vadd.f32 %v722_v34, %v637_v16 }
 0x612   :  { %640 = vst [vmem:[#allocation2] sm:$0x3] %v638_v30 }
 0x613   :  { %651 = dma.vmem_to_hbm [thread:$0]  %s647_s12, 32, %s649_s15, [#allocation3]  }
 0x614   :  { %763 = dma.done.wait [#allocation3], 32  }
 0x615   :  { %764 = vsyncadd [#allocation3], 4294967264 }
 0x616   :  { %656 = vsyncpa [#allocation3], 1 }

</bundles_post_ra>
